<compile_context>
chip_gen: v7x
topology: tpu7x:2x2x1
jax: 0.10.0
libtpu: 0.0.40
codegen_flags: <defaults>
</compile_context>

<pallas_src>
import functools

import jax
import jax.numpy as jnp
from jax.experimental import pallas as pl
from jax.experimental.pallas import tpu as pltpu


def _round_up(x, m):
    return ((x + m - 1) // m) * m


# ----------------------------- Pallas kernel --------------------------------


def place_actor_kernel(
    x_ref,      # [BM, C*L]      flattened inputs, f32
    wband_ref,  # [L, T*Ccnn]    banded conv weight, bf16
    w1f_ref,    # [896, Cfc]     fused fc1 weight (conv(t,c) | x5 | x6), bf16
    w2_ref,     # [Cfc, Apad]    fc3 weight, transposed + lane-padded, bf16
    rows_ref,   # [8, >=T*Ccnn]  packed rows (conv_b | w3 | b3 | w4 | b4 | b1 | b2pad)
    out_ref,    # [BM, Apad]
):
    L = wband_ref.shape[0]
    tc = wband_ref.shape[1]          # T * Ccnn
    cfc = w1f_ref.shape[1]
    a_pad = w2_ref.shape[1]

    xin = x_ref[...]                                   # [BM, C*L] f32
    thr = xin[:, 2 * L:3 * L]                          # throughputs (channel 2)
    s6 = xin[:, 7 * L - 1:7 * L]                       # inputs[:, 6, -1]
    s7 = xin[:, 8 * L - 1:8 * L]                       # inputs[:, 7, -1]

    # Conv1d(1, Ccnn, K) + bias + ReLU as ONE banded matmul.
    conv_pre = jnp.dot(thr.astype(jnp.bfloat16), wband_ref[...],
                       preferred_element_type=jnp.float32)          # [BM, tc]
    conv_feat = jnp.maximum(conv_pre + rows_ref[0:1, :tc], 0.0)

    # actor_fc_3 / actor_fc_4: Linear(1, Cfc) on a scalar == VPU broadcast mul.
    x5 = jnp.maximum(s6 * rows_ref[1:2, :cfc] + rows_ref[2:3, :cfc], 0.0)
    x6 = jnp.maximum(s7 * rows_ref[3:4, :cfc] + rows_ref[4:5, :cfc], 0.0)

    # fc1 as three accumulated dots against 128-aligned weight slices
    # (no [BM, 896] concat copy).
    h = jnp.dot(conv_feat.astype(jnp.bfloat16), w1f_ref[0:tc, :],
                preferred_element_type=jnp.float32)
    h += jnp.dot(x5.astype(jnp.bfloat16), w1f_ref[tc:tc + cfc, :],
                 preferred_element_type=jnp.float32)
    h += jnp.dot(x6.astype(jnp.bfloat16), w1f_ref[tc + cfc:tc + 2 * cfc, :],
                 preferred_element_type=jnp.float32)
    h = jnp.maximum(h + rows_ref[5:6, :cfc], 0.0)                    # [BM, Cfc]

    # fc3 + softmax over the lane-dense padded action dim.  Padded bias lanes
    # are -1e30, so padded columns contribute exp(~-1e30) == 0.
    logits = jnp.dot(h.astype(jnp.bfloat16), w2_ref[...],
                     preferred_element_type=jnp.float32) + rows_ref[6:7, :a_pad]
    m = jnp.max(logits, axis=1, keepdims=True)
    e = jnp.exp(logits - m)
    denom = jnp.sum(e, axis=1, keepdims=True)
    out_ref[...] = (e * pl.reciprocal(denom, approx=True)).astype(out_ref.dtype)


# --------------------- one-time parameter re-layout ---------------------------


def prepare_params(params, L, a_pad=128):
    """Hoisted per-model (NOT per-call) parameter re-layout."""
    conv_w, conv_b = params["conv_w"], params["conv_b"]   # [Ccnn,1,K], [Ccnn]
    w3, b3 = params["w3"], params["b3"]                    # [Cfc,1], [Cfc]
    w4, b4 = params["w4"], params["b4"]
    w1, b1 = params["w1"], params["b1"]                    # [Cfc, 896], [Cfc]
    w2, b2 = params["w2"], params["b2"]                    # [A, Cfc], [A]

    ccnn, _, k = conv_w.shape
    T = L - k + 1
    cfc = w1.shape[0]
    A = w2.shape[0]
    tc = T * ccnn
    a_pad = max(a_pad, _round_up(A, 128))

    # Banded ("im2col on the weight") conv matrix: feature index = t*Ccnn + c.
    cw_t = conv_w[:, 0, :].T                               # [K, Ccnn]
    wband = jnp.zeros((L, tc), jnp.float32)
    for t in range(T):
        wband = wband.at[t:t + k, t * ccnn:(t + 1) * ccnn].set(cw_t)

    # Fused fc1 weight, permuted to match the [conv(t,c) | x5 | x6] layout.
    # torch flattens x_1 [B, Ccnn, T] with index c*T + t.
    w1_conv = w1[:, :tc].reshape(cfc, ccnn, T)             # [out, c, t]
    w1_conv_f = jnp.transpose(w1_conv, (2, 1, 0)).reshape(tc, cfc)  # [(t*Ccnn+c), out]
    w1x5 = w1[:, tc:tc + cfc].T                            # [Cfc, Cfc]
    w1x6 = w1[:, tc + cfc:].T                              # [Cfc, Cfc]
    w1f = jnp.concatenate([w1_conv_f, w1x5, w1x6], axis=0)  # [896, Cfc]

    # fc3 weight, transposed and zero-padded to a lane-dense width.
    w2t = jnp.zeros((cfc, a_pad), jnp.float32).at[:, :A].set(w2.T)

    # Packed row-vector params.
    rows_w = max(tc, a_pad)
    rows = jnp.zeros((8, rows_w), jnp.float32)
    rows = rows.at[0, :tc].set(jnp.tile(conv_b, T))        # conv bias in (t, c) layout
    rows = rows.at[1, :cfc].set(w3[:, 0])
    rows = rows.at[2, :cfc].set(b3)
    rows = rows.at[3, :cfc].set(w4[:, 0])
    rows = rows.at[4, :cfc].set(b4)
    rows = rows.at[5, :cfc].set(b1)
    rows = rows.at[6, :a_pad].set(-1e30)                   # padded logit lanes -> ~0 prob
    rows = rows.at[6, :A].set(b2)

    return {
        "wband": wband.astype(jnp.bfloat16),
        "w1f": w1f.astype(jnp.bfloat16),
        "w2t": w2t.astype(jnp.bfloat16),
        "rows": rows,
    }


# ------------------------------- wrapper -------------------------------------


@functools.partial(jax.jit, static_argnames=("action_space",))
def place_actor_forward(x, prep, *, action_space):
    """x: [B, C, L] f32 (PyTorch NCW). Returns softmax action probs [B, action_space]."""
    B, C, L = x.shape
    a_pad = prep["w2t"].shape[1]

    # ONE contiguous input per block: flatten channels into lanes.
    x_flat = x.reshape(B, C * L)

    # Batch tiling: big blocks amortize per-step overhead, but keep >= 2 blocks
    # for B > 8 so both v7x TensorCores get work (batch axis is "parallel").
    if B <= 8:
        block_b = _round_up(max(B, 1), 8)
    else:
        block_b = min(_round_up(pl.cdiv(B, 2), 8), 1024)
    b_pad = _round_up(B, block_b)
    if b_pad != B:
        x_flat = jnp.pad(x_flat, ((0, b_pad - B), (0, 0)))

    full = pl.BlockSpec(memory_space=pltpu.MemorySpace.VMEM)
    out = pl.pallas_call(
        place_actor_kernel,
        out_shape=jax.ShapeDtypeStruct((b_pad, a_pad), jnp.float32),
        grid=(b_pad // block_b,),
        in_specs=[
            pl.BlockSpec((block_b, C * L), lambda i: (i, 0)),   # flattened inputs
            full,                                               # wband
            full,                                               # w1f
            full,                                               # w2t (padded)
            full,                                               # rows
        ],
        out_specs=pl.BlockSpec((block_b, a_pad), lambda i: (i, 0)),
        compiler_params=pltpu.CompilerParams(
            dimension_semantics=("parallel",),
            vmem_limit_bytes=32 * 1024 * 1024,
        ),
    )(x_flat, prep["wband"], prep["w1f"], prep["w2t"], prep["rows"])
    return out[:B, :action_space]


# --------------------------- reference (pure JAX, f32) ------------------------


def place_actor_reference(x, params):
    conv_w, conv_b = params["conv_w"], params["conv_b"]
    w3, b3 = params["w3"], params["b3"]
    w4, b4 = params["w4"], params["b4"]
    w1, b1 = params["w1"], params["b1"]
    w2, b2 = params["w2"], params["b2"]
    B, _, L = x.shape
    K = conv_w.shape[2]
    T = L - K + 1

    thr = x[:, 2, :]                                              # [B, L]
    cols = jnp.stack([thr[:, t:t + K] for t in range(T)], axis=1)  # [B, T, K]
    conv = jnp.einsum("btk,ck->bct", cols, conv_w[:, 0, :]) + conv_b[None, :, None]
    x1 = jax.nn.relu(conv).reshape(B, -1)                         # [B, Ccnn*T]
    s6 = x[:, 6:7, -1]
    s7 = x[:, 7:8, -1]
    x5 = jax.nn.relu(s6 @ w3.T + b3)
    x6 = jax.nn.relu(s7 @ w4.T + b4)
    cat = jnp.concatenate([x1, x5, x6], axis=1)
    h = jax.nn.relu(cat @ w1.T + b1)
    logits = h @ w2.T + b2
    return jax.nn.softmax(logits, axis=1)


# ------------------------------- main -----------------------------------------

if __name__ == "__main__":
    B = 2
    C = 8            # forward needs channels 2, 6, 7 (3 is unused)
    L = 8            # conv output length = 8 - 4 + 1 = 5 (matches incoming_size)
    ACTION_SPACE = 6
    CCNN = 128
    CFC = 128
    K = 4
    INCOMING = CCNN * 5 + 2 * CFC  # 896

    key = jax.random.PRNGKey(0)
    ks = jax.random.split(key, 13)

    def init(k, shape, scale):
        return scale * jax.random.normal(k, shape, dtype=jnp.float32)

    params = {
        "conv_w": init(ks[0], (CCNN, 1, K), 0.2),
        "conv_b": init(ks[1], (CCNN,), 0.1),
        "w3": init(ks[2], (CFC, 1), 0.2),
        "b3": init(ks[3], (CFC,), 0.1),
        "w4": init(ks[4], (CFC, 1), 0.2),
        "b4": init(ks[5], (CFC,), 0.1),
        "w1": init(ks[6], (CFC, INCOMING), 0.05),
        "b1": init(ks[7], (CFC,), 0.1),
        "w2": init(ks[8], (ACTION_SPACE, CFC), 0.1),
        "b2": init(ks[9], (ACTION_SPACE,), 0.1),
    }

    x = jax.random.normal(ks[10], (B, C, L), dtype=jnp.float32)

    prep = jax.tree_util.tree_map(jax.block_until_ready, prepare_params(params, L))

    out = jax.block_until_ready(
        place_actor_forward(x, prep, action_space=ACTION_SPACE))
    ref = jax.block_until_ready(place_actor_reference(x, params))

    assert out.shape == (B, ACTION_SPACE)
    # approx reciprocal in the softmax epilogue -> tiny normalization error.
    assert jnp.allclose(jnp.sum(out, axis=1), 1.0, atol=5e-3)
    # MXU operands are bf16 (f32 accumulation), so compare against the f32
    # reference with a correspondingly relaxed tolerance.
    assert jnp.allclose(out, ref, rtol=2e-2, atol=2e-2), (out, ref)

    print("KERNEL_OK")
</pallas_src>

<mosaic_0001>
module attributes {stable_mosaic.version = 11 : i64} {
  func.func @place_actor_kernel(%arg0: i32, %arg1: memref<8x64xf32, #tpu.memory_space<vmem>>, %arg2: memref<8x640xbf16, #tpu.memory_space<vmem>>, %arg3: memref<896x128xbf16, #tpu.memory_space<vmem>>, %arg4: memref<128x128xbf16, #tpu.memory_space<vmem>>, %arg5: memref<8x640xf32, #tpu.memory_space<vmem>>, %arg6: memref<8x128xf32, #tpu.memory_space<vmem>>) attributes {dimension_semantics = [#tpu.dimension_semantics<parallel>], iteration_bounds = array<i64: 1>, scalar_prefetch = 0 : i64, scratch_operands = 0 : i64, tpu.core_type = #tpu.core_type<tc>, window_params = [{transform_indices = @transform_0, window_bounds = array<i64: 8, 64>}, {pipeline_mode = #tpu.pipeline_mode<synchronous>, transform_indices = @transform_1, window_bounds = array<i64: 8, 640>}, {pipeline_mode = #tpu.pipeline_mode<synchronous>, transform_indices = @transform_2, window_bounds = array<i64: 896, 128>}, {pipeline_mode = #tpu.pipeline_mode<synchronous>, transform_indices = @transform_3, window_bounds = array<i64: 128, 128>}, {pipeline_mode = #tpu.pipeline_mode<synchronous>, transform_indices = @transform_4, window_bounds = array<i64: 8, 640>}, {transform_indices = @transform_5, window_bounds = array<i64: 8, 128>}]} {
    %c0 = arith.constant 0 : index
    %c0_0 = arith.constant 0 : index
    %0 = vector.load %arg1[%c0, %c0_0] : memref<8x64xf32, #tpu.memory_space<vmem>>, vector<8x64xf32>
    %1 = vector.extract_strided_slice %0 {offsets = [0, 16], sizes = [8, 8], strides = [1, 1]} : vector<8x64xf32> to vector<8x8xf32>
    %2 = vector.extract_strided_slice %0 {offsets = [0, 55], sizes = [8, 1], strides = [1, 1]} : vector<8x64xf32> to vector<8x1xf32>
    %3 = vector.extract_strided_slice %0 {offsets = [0, 63], sizes = [8, 1], strides = [1, 1]} : vector<8x64xf32> to vector<8x1xf32>
    %4 = arith.truncf %1 : vector<8x8xf32> to vector<8x8xbf16>
    %c0_1 = arith.constant 0 : index
    %c0_2 = arith.constant 0 : index
    %5 = vector.load %arg2[%c0_1, %c0_2] : memref<8x640xbf16, #tpu.memory_space<vmem>>, vector<8x640xbf16>
    %cst = arith.constant dense<0.000000e+00> : vector<8x640xf32>
    %6 = tpu.matmul %4, %5, %cst {dimension_numbers = #tpu.dot_dimension_numbers<[1], [0], [0], [1], [0, 0, 1, 1], [], []>} : vector<8x8xbf16>, vector<8x640xbf16>, vector<8x640xf32> -> vector<8x640xf32>
    %c0_3 = arith.constant 0 : index
    %c0_4 = arith.constant 0 : index
    %7 = vector.load %arg5[%c0_3, %c0_4] : memref<8x640xf32, #tpu.memory_space<vmem>>, vector<1x640xf32>
    %8 = vector.broadcast %7 : vector<1x640xf32> to vector<8x640xf32>
    %9 = arith.addf %6, %8 : vector<8x640xf32>
    %cst_5 = arith.constant 0.000000e+00 : f32
    %10 = vector.broadcast %cst_5 : f32 to vector<8x640xf32>
    %11 = arith.maximumf %9, %10 : vector<8x640xf32>
    %c1 = arith.constant 1 : index
    %c0_6 = arith.constant 0 : index
    %12 = vector.load %arg5[%c1, %c0_6] : memref<8x640xf32, #tpu.memory_space<vmem>>, vector<1x128xf32>
    %13 = vector.broadcast %2 : vector<8x1xf32> to vector<8x128xf32>
    %14 = vector.broadcast %12 : vector<1x128xf32> to vector<8x128xf32>
    %15 = arith.mulf %13, %14 : vector<8x128xf32>
    %c2 = arith.constant 2 : index
    %c0_7 = arith.constant 0 : index
    %16 = vector.load %arg5[%c2, %c0_7] : memref<8x640xf32, #tpu.memory_space<vmem>>, vector<1x128xf32>
    %17 = vector.broadcast %16 : vector<1x128xf32> to vector<8x128xf32>
    %18 = arith.addf %15, %17 : vector<8x128xf32>
    %cst_8 = arith.constant 0.000000e+00 : f32
    %19 = vector.broadcast %cst_8 : f32 to vector<8x128xf32>
    %20 = arith.maximumf %18, %19 : vector<8x128xf32>
    %c3 = arith.constant 3 : index
    %c0_9 = arith.constant 0 : index
    %21 = vector.load %arg5[%c3, %c0_9] : memref<8x640xf32, #tpu.memory_space<vmem>>, vector<1x128xf32>
    %22 = vector.broadcast %3 : vector<8x1xf32> to vector<8x128xf32>
    %23 = vector.broadcast %21 : vector<1x128xf32> to vector<8x128xf32>
    %24 = arith.mulf %22, %23 : vector<8x128xf32>
    %c4 = arith.constant 4 : index
    %c0_10 = arith.constant 0 : index
    %25 = vector.load %arg5[%c4, %c0_10] : memref<8x640xf32, #tpu.memory_space<vmem>>, vector<1x128xf32>
    %26 = vector.broadcast %25 : vector<1x128xf32> to vector<8x128xf32>
    %27 = arith.addf %24, %26 : vector<8x128xf32>
    %cst_11 = arith.constant 0.000000e+00 : f32
    %28 = vector.broadcast %cst_11 : f32 to vector<8x128xf32>
    %29 = arith.maximumf %27, %28 : vector<8x128xf32>
    %30 = arith.truncf %11 : vector<8x640xf32> to vector<8x640xbf16>
    %c0_12 = arith.constant 0 : index
    %c0_13 = arith.constant 0 : index
    %31 = vector.load %arg3[%c0_12, %c0_13] : memref<896x128xbf16, #tpu.memory_space<vmem>>, vector<640x128xbf16>
    %cst_14 = arith.constant dense<0.000000e+00> : vector<8x128xf32>
    %32 = tpu.matmul %30, %31, %cst_14 {dimension_numbers = #tpu.dot_dimension_numbers<[1], [0], [0], [1], [0, 0, 1, 1], [], []>} : vector<8x640xbf16>, vector<640x128xbf16>, vector<8x128xf32> -> vector<8x128xf32>
    %33 = arith.truncf %20 : vector<8x128xf32> to vector<8x128xbf16>
    %c640 = arith.constant 640 : index
    %c0_15 = arith.constant 0 : index
    %34 = vector.load %arg3[%c640, %c0_15] : memref<896x128xbf16, #tpu.memory_space<vmem>>, vector<128x128xbf16>
    %cst_16 = arith.constant dense<0.000000e+00> : vector<8x128xf32>
    %35 = tpu.matmul %33, %34, %cst_16 {dimension_numbers = #tpu.dot_dimension_numbers<[1], [0], [0], [1], [0, 0, 1, 1], [], []>} : vector<8x128xbf16>, vector<128x128xbf16>, vector<8x128xf32> -> vector<8x128xf32>
    %36 = arith.addf %32, %35 : vector<8x128xf32>
    %37 = arith.truncf %29 : vector<8x128xf32> to vector<8x128xbf16>
    %c768 = arith.constant 768 : index
    %c0_17 = arith.constant 0 : index
    %38 = vector.load %arg3[%c768, %c0_17] : memref<896x128xbf16, #tpu.memory_space<vmem>>, vector<128x128xbf16>
    %cst_18 = arith.constant dense<0.000000e+00> : vector<8x128xf32>
    %39 = tpu.matmul %37, %38, %cst_18 {dimension_numbers = #tpu.dot_dimension_numbers<[1], [0], [0], [1], [0, 0, 1, 1], [], []>} : vector<8x128xbf16>, vector<128x128xbf16>, vector<8x128xf32> -> vector<8x128xf32>
    %40 = arith.addf %36, %39 : vector<8x128xf32>
    %c5 = arith.constant 5 : index
    %c0_19 = arith.constant 0 : index
    %41 = vector.load %arg5[%c5, %c0_19] : memref<8x640xf32, #tpu.memory_space<vmem>>, vector<1x128xf32>
    %42 = vector.broadcast %41 : vector<1x128xf32> to vector<8x128xf32>
    %43 = arith.addf %40, %42 : vector<8x128xf32>
    %cst_20 = arith.constant 0.000000e+00 : f32
    %44 = vector.broadcast %cst_20 : f32 to vector<8x128xf32>
    %45 = arith.maximumf %43, %44 : vector<8x128xf32>
    %46 = arith.truncf %45 : vector<8x128xf32> to vector<8x128xbf16>
    %c0_21 = arith.constant 0 : index
    %c0_22 = arith.constant 0 : index
    %47 = vector.load %arg4[%c0_21, %c0_22] : memref<128x128xbf16, #tpu.memory_space<vmem>>, vector<128x128xbf16>
    %cst_23 = arith.constant dense<0.000000e+00> : vector<8x128xf32>
    %48 = tpu.matmul %46, %47, %cst_23 {dimension_numbers = #tpu.dot_dimension_numbers<[1], [0], [0], [1], [0, 0, 1, 1], [], []>} : vector<8x128xbf16>, vector<128x128xbf16>, vector<8x128xf32> -> vector<8x128xf32>
    %c6 = arith.constant 6 : index
    %c0_24 = arith.constant 0 : index
    %49 = vector.load %arg5[%c6, %c0_24] : memref<8x640xf32, #tpu.memory_space<vmem>>, vector<1x128xf32>
    %50 = vector.broadcast %49 : vector<1x128xf32> to vector<8x128xf32>
    %51 = arith.addf %48, %50 : vector<8x128xf32>
    %cst_25 = arith.constant dense<0xFF800000> : vector<8xf32>
    %52 = vector.multi_reduction <maximumf>, %51, %cst_25 [1] : vector<8x128xf32> to vector<8xf32>
    %53 = vector.shape_cast %52 : vector<8xf32> to vector<8x1xf32>
    %54 = vector.broadcast %53 : vector<8x1xf32> to vector<8x128xf32>
    %55 = arith.subf %51, %54 : vector<8x128xf32>
    %56 = math.exp %55 : vector<8x128xf32>
    %cst_26 = arith.constant dense<0.000000e+00> : vector<8xf32>
    %57 = vector.multi_reduction <add>, %56, %cst_26 [1] : vector<8x128xf32> to vector<8xf32>
    %58 = vector.shape_cast %57 : vector<8xf32> to vector<8x1xf32>
    %59 = tpu.reciprocal %58 {approx = true} : vector<8x1xf32> -> vector<8x1xf32>
    %60 = vector.broadcast %59 : vector<8x1xf32> to vector<8x128xf32>
    %61 = arith.mulf %56, %60 : vector<8x128xf32>
    %c0_27 = arith.constant 0 : index
    %c0_28 = arith.constant 0 : index
    %62 = vector.load %arg6[%c0_27, %c0_28] : memref<8x128xf32, #tpu.memory_space<vmem>>, vector<8x128xf32>
    tpu.vector_store %arg6[%c0_27, %c0_28], %61 {strides = array<i32>} : memref<8x128xf32, #tpu.memory_space<vmem>>, vector<8x128xf32>,
    return
  }
  func.func @transform_0(%arg0: i32) -> (i32, i32) {
    %c0_i32 = arith.constant 0 : i32
    %c0_i32_0 = arith.constant 0 : i32
    return %arg0, %c0_i32 : i32, i32
  }
  func.func @transform_1(%arg0: i32) -> (i32, i32) {
    %c0_i32 = arith.constant 0 : i32
    %c0_i32_0 = arith.constant 0 : i32
    %c0_i32_1 = arith.constant 0 : i32
    return %c0_i32, %c0_i32_0 : i32, i32
  }
  func.func @transform_2(%arg0: i32) -> (i32, i32) {
    %c0_i32 = arith.constant 0 : i32
    %c0_i32_0 = arith.constant 0 : i32
    %c0_i32_1 = arith.constant 0 : i32
    return %c0_i32, %c0_i32_0 : i32, i32
  }
  func.func @transform_3(%arg0: i32) -> (i32, i32) {
    %c0_i32 = arith.constant 0 : i32
    %c0_i32_0 = arith.constant 0 : i32
    %c0_i32_1 = arith.constant 0 : i32
    return %c0_i32, %c0_i32_0 : i32, i32
  }
  func.func @transform_4(%arg0: i32) -> (i32, i32) {
    %c0_i32 = arith.constant 0 : i32
    %c0_i32_0 = arith.constant 0 : i32
    %c0_i32_1 = arith.constant 0 : i32
    return %c0_i32, %c0_i32_0 : i32, i32
  }
  func.func @transform_5(%arg0: i32) -> (i32, i32) {
    %c0_i32 = arith.constant 0 : i32
    %c0_i32_0 = arith.constant 0 : i32
    return %arg0, %c0_i32 : i32, i32
  }
}

</mosaic_0001>

<bundles_post_ra>
// kernel: place_actor_forward.1
= control target key start
LH: loop header
LB: loop body
LE: loop exit
PB: predicated region body
PF: predicated region fallthrough
CT: control target
= control target key end

     0   :  { %10 = vsyncpa [#allocation3], 0  ;;  %s1620_s0 = inlined_call_operand.vmem [shape: f32[8,64], index: 0, kind: input, shape index: {}]   ;;  %s1621_s1 = inlined_call_operand.vmem [shape: bf16[8,640], index: 1, kind: input, shape index: {}]   ;;  %s1622_s2 = inlined_call_operand.hbm [shape: bf16[896,128], index: 2, kind: input, shape index: {}]   ;;  %s1623_s3 = inlined_call_operand.hbm [shape: bf16[128,128], index: 3, kind: input, shape index: {}]   ;;  %s1624_s4 = inlined_call_operand.hbm [shape: f32[8,640], index: 4, kind: input, shape index: {}]   ;;  %s1625_s5 = inlined_call_operand.vmem [shape: f32[8,128], index: 5, kind: output, shape index: {}]  }
   0x1   :  { %11 = vsyncpa [#allocation5], 0  ;;  %s1456_s18 = smov [#allocation4]   ;;  %s1457_s20 = smov [#allocation2]  }
   0x2   :  { %s33_s19 = sshll.u32 %s1456_s18, 4  ;;  %s21_s21 = sshll.u32 %s1457_s20, 4  ;;  %s34_s19 = int_to_ptr.vmem [resolvable:$true] %s33_s19  ;;  %s1497_s21 = int_to_ptr.vmem [resolvable:$true] %s21_s21 }
   0x3   :  { %s1386_s24 = scalar_lea.hbm %s1623_s3, 1024 }
   0x4   :  { %p1387_p0 = scmp.ne.s32.totalorder %s1623_s3, %s1386_s24  ;;  %p1390_p1 = scmp.lt.u32.totalorder %s1386_s24, %s1623_s3 }
   0x6   :  { %p1392_p2 = pnand %p1390_p1, %p1387_p0 }
   0x8   :  { %1395 = shalt.err (!%p1392_p2)
}
   0x9   :  { %s1396_s29 = scalar_lea.vmem %s34_s19, 1024  ;;  %p1401_p4 = scmp.lt.s32.totalorder %s34_s19, %s34_s19 }
   0xa   :  { %p1397_p3 = scmp.ne.s32.totalorder %s34_s19, %s1396_s29  ;;  %p1402_p5 = scmp.lt.s32.totalorder %s1396_s29, %s1396_s29 }
   0xc   :  { %p1403_p6 = por %p1402_p5, %p1401_p4 }
   0xe   :  { %p1404_p7 = pnand %p1403_p6, %p1397_p3 }
  0x10   :  { %1407 = shalt.err (!%p1404_p7)
}
  0x11   :  { %s1458_s30 = smov 64   ;;  %s1459_s6 = smov 4  }
  0x12   :  { %39 = dma.hbm_to_vmem [thread:$0]  %s1623_s3, 1024, %s34_s19, [#allocation5], %s1458_s30, %s1458_s30, %s1459_s6  }
  0x13   :  { %s1408_s11 = scalar_lea.hbm %s1622_s2, 7168 }
  0x14   :  { %p1409_p8 = scmp.ne.s32.totalorder %s1622_s2, %s1408_s11  ;;  %p1412_p9 = scmp.lt.u32.totalorder %s1408_s11, %s1622_s2 }
  0x16   :  { %p1414_p10 = pnand %p1412_p9, %p1409_p8 }
  0x18   :  { %1417 = shalt.err (!%p1414_p10)
}
  0x19   :  { %s1418_s16 = scalar_lea.vmem %s1497_s21, 7168  ;;  %p1423_p12 = scmp.lt.s32.totalorder %s1497_s21, %s1497_s21 }
  0x1a   :  { %p1419_p11 = scmp.ne.s32.totalorder %s1497_s21, %s1418_s16  ;;  %p1424_p13 = scmp.lt.s32.totalorder %s1418_s16, %s1418_s16 }
  0x1c   :  { %p1425_p0 = por %p1424_p13, %p1423_p12 }
  0x1e   :  { %p1426_p1 = pnand %p1425_p0, %p1419_p11 }
  0x20   :  { %1429 = shalt.err (!%p1426_p1)
}
  0x21   :  { %27 = dma.hbm_to_vmem [thread:$0]  %s1622_s2, 7168, %s1497_s21, [#allocation3], %s1458_s30, %s1458_s30, %s1459_s6  }
  0x22   :  { %s1460_s18 = smov [#allocation6]   ;;  %s1430_s23 = scalar_lea.hbm %s1624_s4, 640 }
  0x23   :  { %s46_s19 = sshll.u32 %s1460_s18, 4  ;;  %p1431_p2 = scmp.ne.s32.totalorder %s1624_s4, %s1430_s23  ;;  %s47_s19 = int_to_ptr.vmem [resolvable:$true] %s46_s19 }
  0x24   :  { %p1434_p3 = scmp.lt.u32.totalorder %s1430_s23, %s1624_s4 }
  0x26   :  { %p1436_p4 = pnand %p1434_p3, %p1431_p2 }
  0x28   :  { %1439 = shalt.err (!%p1436_p4)
}
  0x29   :  { %s1440_s28 = scalar_lea.vmem %s47_s19, 640  ;;  %p1445_p6 = scmp.lt.s32.totalorder %s47_s19, %s47_s19 }
  0x2a   :  { %p1441_p5 = scmp.ne.s32.totalorder %s47_s19, %s1440_s28  ;;  %p1446_p7 = scmp.lt.s32.totalorder %s1440_s28, %s1440_s28 }
  0x2c   :  { %p1447_p8 = por %p1446_p7, %p1445_p6 }
  0x2e   :  { %p1448_p9 = pnand %p1447_p8, %p1441_p5 }
  0x30   :  { %1451 = shalt.err (!%p1448_p9)
}
  0x31   :  { %49 = dma.hbm_to_vmem [thread:$0]  %s1624_s4, 640, %s47_s19, [#allocation5]  }
  0x32   :  { %1452 = dma.done.wait [#allocation3], 7168  }
  0x33   :  { %1453 = vsyncadd [#allocation3], 4294960128 }
  0x34   :  { %1454 = dma.done.wait [#allocation5], 1664  }
  0x35   :  { %1455 = vsyncadd [#allocation5], 4294965632  ;;  %v1461_v0 = vmov 0   ;;  %v1462_v1 = vmov 55   ;;  %v1463_v2 = vmov 63   ;;  %v60_v3 = vld [vmem:[%s1620_s0] sm:$0xff] }
  0x36   :  { %162 = vmatprep.mubr.bf16.mxu0 %v1461_v0  ;;  %203 = vmatprep.mubr.bf16.mxu1 %v1461_v0  ;;  %v62_v4 = vld [vmem:[%s1621_s1] sm:$0xff]  ;;  %vm114_vm0 = vcmask 1043456   ;;  %v63_v5 = vld [vmem:[%s1621_s1 + $0x8] sm:$0xff]  ;;  %v61_v6 = vpack.c.bf16 %v60_v3, %v60_v3  ;;  %s1464_s9 = smov 112   ;;  %v1465_v13 = vmov 0.0   ;;  %vm110_vm1 = vcmask 64512  }
  0x37   :  { %1310 = vset.pattern.permute.xlu0 %v1462_v1  ;;  %1311 = vset.pattern.permute.xlu1 %v1463_v2  ;;  %v1058_v7 = vcombine.high %v62_v4, %v62_v4  ;;  %v1060_v8 = vcombine.high %v63_v5, %v63_v5  ;;  %v1057_v9 = vcombine.low %v62_v4, %v62_v4  ;;  %v1317_v14 = vld [vmem:[%s1621_s1 + $0x10] ss:$0 sps:$4 sm:$0xff]   ;;  %v1318_v16 = vld [vmem:[#allocation2 + $0x140] sm:$0xff]   ;;  %vm1466_vm2 = vmmov 0   ;;  %v1319_v19 = vld [vmem:[#allocation2 + $0x148] sm:$0xff]  }
  0x38   :  { %269 = vperm.xlu1 %1311, %v60_v3   ;;  %v1059_v10 = vcombine.low %v63_v5, %v63_v5  ;;  %95 = vrot.lane.b32.xlu0 %v61_v6, %s1464_s9  ;;  %v128_v15 = vsel %vm114_vm0, %v1317_v14, 0  ;;  %v1326_v18 = vld [vmem:[#allocation2 + $0x40] sm:$0xff]   ;;  %v1320_v21 = vld [vmem:[#allocation2 + $0x150] sm:$0xff]   ;;  %v1330_v22 = vld [vmem:[#allocation2 + $0x48] sm:$0xff]   ;;  %v69_v0 = vlaneseq }
  0x39   :  { %1062 = vmatprep.subr.msk.bf16.mxu0 %vm114_vm0, %v1058_v7  ;;  %v116_v11 = vsel %vm114_vm0, %v1057_v9, 0  ;;  %1064 = vmatprep.subr.msk.bf16.mxu1 %vm114_vm0, %v1060_v8  ;;  %v1328_v20 = vld [vmem:[#allocation2] sm:$0xff]   ;;  %v1332_v23 = vld [vmem:[#allocation2 + $0x8] sm:$0xff]   ;;  %v1321_v24 = vld [vmem:[#allocation2 + $0x158] sm:$0xff]  }
  0x3a   :  { %131 = vmatpush1.bf16.msra.mxu0 %v116_v11  ;;  %v122_v12 = vsel %vm114_vm0, %v1059_v10, 0  ;;  %v1334_v25 = vld [vmem:[#allocation2 + $0x50] sm:$0xff]   ;;  %v1322_v27 = vld [vmem:[#allocation2 + $0x160] sm:$0xff]   ;;  %v1338_v29 = vld [vmem:[#allocation2 + $0x58] sm:$0xff]   ;;  %v1575_v1 = vshrl.u32 %v69_v0, 7 }
  0x3b   :  { %172 = vmatpush1.bf16.msra.mxu1 %v122_v12  ;;  %1213 = vmatprep.subr.bf16.mxu0 %v1465_v13  ;;  %v1336_v26 = vld [vmem:[#allocation2 + $0x10] sm:$0xff]   ;;  %v257_v28 = vld [vmem:[#allocation6 + $0x1] ss:$0 sm:$0xff]  ;;  %v1340_v32 = vld [vmem:[#allocation2 + $0x18] sm:$0xff]  }
  0x3c   :  { %1219 = vmatprep.subr.bf16.mxu1 %v1465_v13  ;;  %260 = vperm.xlu0 %1310, %v60_v3   ;;  %v1323_v33 = vld [vmem:[#allocation2 + $0x168] sm:$0xff]   ;;  %v264_v34 = vld [vmem:[#allocation6 + $0x2] ss:$0 sm:$0xff]  ;;  %v1324_v38 = vld [vmem:[#allocation2 + $0x170] sm:$0xff]   ;;  %v71_v5 = vsub.s32 0, %v1575_v1  ;;  %v79_v6 = vsub.s32 2, %v1575_v1 }
  0x3d   :  { %v1342_v35 = vld [vmem:[#allocation2 + $0x60] sm:$0xff]   ;;  %v1346_v39 = vld [vmem:[#allocation2 + $0x68] sm:$0xff]   ;;  %v1325_v42 = vld [vmem:[#allocation2 + $0x178] sm:$0xff]   ;;  %v75_v7 = vsub.s32 1, %v1575_v1  ;;  %v83_v8 = vsub.s32 3, %v1575_v1 }
  0x3e   :  { %v1344_v37 = vld [vmem:[#allocation2 + $0x20] sm:$0xff]   ;;  %v1348_v41 = vld [vmem:[#allocation2 + $0x28] sm:$0xff]   ;;  %v1335_v48 = vld [vmem:[#allocation2 + $0xd0] sm:$0xff]  }
  0x3f   :  { %v1327_v43 = vld [vmem:[#allocation2 + $0xc0] sm:$0xff]   ;;  %v1331_v46 = vld [vmem:[#allocation2 + $0xc8] sm:$0xff]   ;;  %v1337_v49 = vld [vmem:[#allocation2 + $0x90] sm:$0xff]  }
  0x40   :  { %1312 = vset.pattern.permute.xlu0 %v1463_v2  ;;  %v1329_v45 = vld [vmem:[#allocation2 + $0x80] sm:$0xff]   ;;  %v1333_v47 = vld [vmem:[#allocation2 + $0x88] sm:$0xff]   ;;  %v1339_v50 = vld [vmem:[#allocation2 + $0xd8] sm:$0xff]  }
  0x41   :  { %v1341_v51 = vld [vmem:[#allocation2 + $0x98] sm:$0xff]   ;;  %v1343_v52 = vld [vmem:[#allocation2 + $0xe0] sm:$0xff]   ;;  %v1347_v54 = vld [vmem:[#allocation2 + $0xe8] sm:$0xff]  }
  0x42   :  { %v1345_v53 = vld [vmem:[#allocation2 + $0xa0] sm:$0xff]   ;;  %v1349_v55 = vld [vmem:[#allocation2 + $0xa8] sm:$0xff]   ;;  %v1350_v56 = vld [vmem:[#allocation2 + $0x70] sm:$0xff]  }
  0x43   :  { %v1351_v57 = vld [vmem:[#allocation2 + $0xf0] sm:$0xff]   ;;  %v1354_v60 = vld [vmem:[#allocation2 + $0x78] sm:$0xff]   ;;  %v66_v3 = vld [vmem:[#allocation6] ss:$8 sm:$0x10] }
  0x44   :  { %v1352_v58 = vld [vmem:[#allocation2 + $0x30] sm:$0xff]   ;;  %v1355_v61 = vld [vmem:[#allocation2 + $0xf8] sm:$0xff]  }
  0x45   :  { %v1353_v59 = vld [vmem:[#allocation2 + $0xb0] sm:$0xff]   ;;  %v1356_v62 = vld [vmem:[#allocation2 + $0x38] sm:$0xff]  }
  0x46   :  { %v1357_v63 = vld [vmem:[#allocation2 + $0xb8] sm:$0xff]  }
  0x47   :  { %v65_v2 = vld [vmem:[#allocation6] ss:$8 sm:$0xf] }
  0x48   :  { %v1577_v4 = vor.u32 %v66_v3, %v65_v2 }
  0x4a   :  { %v72_v9 = vrot.slane %v1577_v4, %v71_v5  ;;  %v80_v10 = vrot.slane %v1577_v4, %v79_v6  ;;  %v76_v11 = vrot.slane %v1577_v4, %v75_v7  ;;  %v84_v12 = vrot.slane %v1577_v4, %v83_v8  ;;  %v1374_v6 = vld [vmem:[#allocation4] sm:$0xff]   ;;  %v1375_v7 = vld [vmem:[#allocation4 + $0x8] sm:$0xff]   ;;  %v1376_v8 = vld [vmem:[#allocation4 + $0x10] sm:$0xff]  }
  0xaa   :  { %v96_v17 = vpop.permute.xlu0 %95 }
  0xab   :  { %1063 = vmatmul.mubr.msk.bf16.vlgmr.msra.gmra.mrb[0].mxu0 %vm110_vm1, %v96_v17  ;;  %1065 = vmatmul.mubr.msk.bf16.vlgmr.msra.gmra.mrb[0].mxu1 %vm110_vm1, %v96_v17 }
  0xac   :  { %1214 = vmatpush3.bf16.msra.mxu0 %v128_v15  ;;  %1215 = vmatprep.mubr.msk.bf16.mxu0 %vm1466_vm2, %v1465_v13 }
  0xad   :  { %1220 = vmatpush3.bf16.msra.mxu1 %v1318_v16  ;;  %1235 = vmatprep.mubr.msk.bf16.mxu1 %vm1466_vm2, %v1465_v13 }
  0xae   :  { %1221 = vmatprep.subr.bf16.mxu1 %v1465_v13  ;;  %1142 = vmatprep.subr.bf16.mxu0 %v1326_v18 }
  0xb1   :  { %1222 = vmatpush3.bf16.msra.mxu1 %v1319_v19 }
  0xb2   :  { %1223 = vmatprep.subr.bf16.mxu1 %v1465_v13 }
  0xb3   :  { %1216 = vmatmul.mubr.msk.bf16.vlgmr.msra.gmra.mrb[4].mxu0 %vm110_vm1, %v96_v17 }
  0xb4   :  { %1143 = vmatpush3.bf16.msra.mxu0 %v1328_v20 }
  0xb5   :  { %1224 = vmatpush3.bf16.msra.mxu1 %v1320_v21  ;;  %1144 = vmatprep.subr.bf16.mxu0 %v1330_v22 }
  0xb6   :  { %1225 = vmatprep.subr.bf16.mxu1 %v1465_v13 }
  0xb8   :  { %1145 = vmatpush3.bf16.msra.mxu0 %v1332_v23 }
  0xb9   :  { %1226 = vmatpush3.bf16.msra.mxu1 %v1321_v24  ;;  %1146 = vmatprep.subr.bf16.mxu0 %v1334_v25 }
  0xba   :  { %1227 = vmatprep.subr.bf16.mxu1 %v1465_v13 }
  0xbb   :  { %v261_v30 = vpop.permute.xlu0 %260 }
  0xbc   :  { %v263_v31 = vmul.f32 %v261_v30, %v257_v28  ;;  %1147 = vmatpush3.bf16.msra.mxu0 %v1336_v26 }
  0xbd   :  { %1228 = vmatpush3.bf16.msra.mxu1 %v1322_v27  ;;  %1148 = vmatprep.subr.bf16.mxu0 %v1338_v29 }
  0xbe   :  { %1229 = vmatprep.subr.bf16.mxu1 %v1465_v13  ;;  %v265_v36 = vadd.f32 %v264_v34, %v263_v31 }
  0xc0   :  { %1149 = vmatpush3.bf16.msra.mxu0 %v1340_v32  ;;  %v266_v40 = vmax.f32 %v265_v36, 0.0  ;;  %v1358_v32 = vld [vmem:[#allocation2 + $0x100] sm:$0xff]  }
  0xc1   :  { %1230 = vmatpush3.bf16.msra.mxu1 %v1323_v33  ;;  %1150 = vmatprep.subr.bf16.mxu0 %v1342_v35  ;;  %v1359_v33 = vld [vmem:[#allocation2 + $0x180] sm:$0xff]  }
  0xc2   :  { %1231 = vmatprep.subr.bf16.mxu1 %v1465_v13  ;;  %v361_v44 = vpack.c.bf16 %v266_v40, %v266_v40  ;;  %v1361_v40 = vld [vmem:[#allocation2 + $0x188] sm:$0xff]  }
  0xc4   :  { %1151 = vmatpush3.bf16.msra.mxu0 %v1344_v37 }
  0xc5   :  { %1232 = vmatpush3.bf16.msra.mxu1 %v1324_v38  ;;  %1152 = vmatprep.subr.bf16.mxu0 %v1346_v39  ;;  %v1360_v39 = vld [vmem:[#allocation2 + $0x108] sm:$0xff]  }
  0xc6   :  { %1233 = vmatprep.subr.bf16.mxu1 %v1465_v13 }
  0xc8   :  { %1153 = vmatpush3.bf16.msra.mxu0 %v1348_v41 }
  0xc9   :  { %1234 = vmatpush3.bf16.msra.mxu1 %v1325_v42  ;;  %1154 = vmatprep.subr.bf16.mxu0 %v1350_v56  ;;  %v1362_v42 = vld [vmem:[#allocation2 + $0x110] sm:$0xff]  }
  0xca   :  { %1164 = vmatprep.subr.bf16.mxu1 %v1327_v43  ;;  %v1363_v43 = vld [vmem:[#allocation2 + $0x190] sm:$0xff]  }
  0xcc   :  { %1236 = vmatmul.mubr.bf16.vlgmr.msra.gmra.mrb[4].mxu1 %v361_v44  ;;  %1155 = vmatpush3.bf16.msra.mxu0 %v1352_v58  ;;  %v1364_v44 = vld [vmem:[#allocation2 + $0x118] sm:$0xff]   ;;  %v1371_v58 = vld [vmem:[#allocation2 + $0x1b0] sm:$0xff]  }
  0xcd   :  { %1165 = vmatpush3.bf16.msra.mxu1 %v1329_v45  ;;  %1156 = vmatprep.subr.bf16.mxu0 %v1354_v60  ;;  %v1365_v45 = vld [vmem:[#allocation2 + $0x198] sm:$0xff]  }
  0xce   :  { %1166 = vmatprep.subr.bf16.mxu1 %v1331_v46  ;;  %v1366_v46 = vld [vmem:[#allocation2 + $0x120] sm:$0xff]  }
  0xd0   :  { %1157 = vmatpush3.bf16.msra.mxu0 %v1356_v62  ;;  %v1372_v62 = vld [vmem:[#allocation2 + $0x138] sm:$0xff]  }
  0xd1   :  { %1167 = vmatpush3.bf16.msra.mxu1 %v1333_v47  ;;  %1239 = vmatprep.subr.bf16.mxu0 %v1465_v13  ;;  %v1367_v47 = vld [vmem:[#allocation2 + $0x1a0] sm:$0xff]  }
  0xd2   :  { %1168 = vmatprep.subr.bf16.mxu1 %v1335_v48  ;;  %v267_v48 = vld [vmem:[#allocation6 + $0x3] ss:$0 sm:$0xff] }
  0xd5   :  { %1169 = vmatpush3.bf16.msra.mxu1 %v1337_v49  ;;  %v270_v49 = vpop.permute.xlu1 %269 }
  0xd6   :  { %1170 = vmatprep.subr.bf16.mxu1 %v1339_v50  ;;  %v87_v50 = vsub.s32 4, %v1575_v1 }
  0xd9   :  { %1171 = vmatpush3.bf16.msra.mxu1 %v1341_v51  ;;  %v272_v51 = vmul.f32 %v270_v49, %v267_v48 }
  0xda   :  { %1172 = vmatprep.subr.bf16.mxu1 %v1343_v52  ;;  %v1368_v52 = vld [vmem:[#allocation2 + $0x128] sm:$0xff]  }
  0xdd   :  { %1173 = vmatpush3.bf16.msra.mxu1 %v1345_v53  ;;  %v1369_v53 = vld [vmem:[#allocation2 + $0x1a8] sm:$0xff]  }
  0xde   :  { %1174 = vmatprep.subr.bf16.mxu1 %v1347_v54  ;;  %v273_v54 = vld [vmem:[#allocation6 + $0x4] ss:$0 sm:$0xff] }
  0xdf   :  { %v274_v56 = vadd.f32 %v273_v54, %v272_v51 }
  0xe1   :  { %1175 = vmatpush3.bf16.msra.mxu1 %v1349_v55  ;;  %v88_v55 = vrot.slane %v1577_v4, %v87_v50  ;;  %v275_v60 = vmax.f32 %v274_v56, 0.0 }
  0xe2   :  { %1176 = vmatprep.subr.bf16.mxu1 %v1351_v57  ;;  %v1370_v57 = vld [vmem:[#allocation2 + $0x130] sm:$0xff]  }
  0xe3   :  { %v826_v4 = vpack.c.bf16 %v275_v60, %v275_v60 }
  0xe5   :  { %1177 = vmatpush3.bf16.msra.mxu1 %v1353_v59 }
  0xe6   :  { %1178 = vmatprep.subr.bf16.mxu1 %v1355_v61 }
  0xe9   :  { %1179 = vmatpush3.bf16.msra.mxu1 %v1357_v63  ;;  %v1373_v63 = vld [vmem:[#allocation2 + $0x1b8] sm:$0xff]  }
  0xea   :  { %1259 = vmatprep.subr.bf16.mxu1 %v1465_v13 }
 0x17e   :  { %v164_v14 = vpop.f32.mrb[0].mxu0  ;;  %v205_v15 = vpop.f32.mrb[0].mxu1 }
 0x17f   :  { %v165_v16 = vadd.f32 %v164_v14, %v72_v9  ;;  %v206_v17 = vadd.f32 %v205_v15, %v80_v10  ;;  %v166_v18 = vpop.f32.mrb[1].mxu0  ;;  %v207_v19 = vpop.f32.mrb[1].mxu1  ;;  %v1377_v9 = vld [vmem:[#allocation4 + $0x18] sm:$0xff]   ;;  %v1378_v10 = vld [vmem:[#allocation4 + $0x20] sm:$0xff]  }
 0x180   :  { %v167_v20 = vadd.f32 %v166_v18, %v76_v11  ;;  %v208_v21 = vadd.f32 %v207_v19, %v84_v12  ;;  %v168_v22 = vpop.f32.mrb[2].mxu0  ;;  %v209_v23 = vpop.f32.mrb[2].mxu1  ;;  %v1379_v11 = vld [vmem:[#allocation4 + $0x28] sm:$0xff]   ;;  %v1380_v12 = vld [vmem:[#allocation4 + $0x30] sm:$0xff]   ;;  %v1381_v14 = vld [vmem:[#allocation4 + $0x38] sm:$0xff]  }
 0x181   :  { %v252_v24 = vmax.f32 %v165_v16, 0.0  ;;  %v254_v25 = vmax.f32 %v206_v17, 0.0  ;;  %v169_v26 = vpop.f32.mrb[3].mxu0  ;;  %v210_v27 = vpop.f32.mrb[3].mxu1 }
 0x182   :  { %v253_v28 = vmax.f32 %v167_v20, 0.0  ;;  %v255_v29 = vmax.f32 %v208_v21, 0.0 }
 0x183   :  { %v276_v34 = vpack.c.bf16 %v252_v24, %v252_v24  ;;  %v278_v35 = vpack.c.bf16 %v254_v25, %v254_v25 }
 0x184   :  { %v277_v30 = vpack.c.bf16 %v253_v28, %v253_v28  ;;  %v279_v31 = vpack.c.bf16 %v255_v29, %v255_v29 }
 0x186   :  { %v246_v36 = vpop.f32.mrb[4].mxu0  ;;  %738 = vmatprep.mubr.bf16.mxu0 %v277_v30  ;;  %778 = vmatprep.mubr.bf16.mxu1 %v279_v31 }
 0x187   :  { %v1217_v37 = vpop.f32.mrb[5].mxu0  ;;  %739 = vmatmul.mubr.bf16.vlgmr.msra.gmra.mrb[8].mxu0 %v276_v34  ;;  %779 = vmatmul.mubr.bf16.vlgmr.msra.gmra.mrb[8].mxu1 %v278_v35  ;;  %v247_v59 = vadd.f32 %v246_v36, %v88_v55 }
 0x188   :  { %1240 = vmatpush3.bf16.msra.mxu0 %v1358_v32  ;;  %1260 = vmatpush3.bf16.msra.mxu1 %v1359_v33  ;;  %v249_v38 = vpop.f32.mrb[6].mxu0 }
 0x189   :  { %v1218_v41 = vpop.f32.mrb[7].mxu0  ;;  %1241 = vmatprep.subr.bf16.mxu0 %v1465_v13  ;;  %1261 = vmatprep.subr.bf16.mxu1 %v1465_v13  ;;  %v256_v1 = vmax.f32 %v247_v59, 0.0 }
 0x18a   :  { %1255 = vmatprep.mubr.msk.bf16.mxu0 %vm1466_vm2, %v1465_v13  ;;  %1275 = vmatprep.mubr.msk.bf16.mxu1 %vm1466_vm2, %v1465_v13 }
 0x18b   :  { %v280_v5 = vpack.c.bf16 %v256_v1, %v256_v1 }
 0x18c   :  { %1242 = vmatpush3.bf16.msra.mxu0 %v1360_v39  ;;  %1262 = vmatpush3.bf16.msra.mxu1 %v1361_v40  ;;  %v952_v40 = vld [vmem:[#allocation6 + $0x6] ss:$0 sm:$0xff] }
 0x18d   :  { %1243 = vmatprep.subr.bf16.mxu0 %v1465_v13  ;;  %1263 = vmatprep.subr.bf16.mxu1 %v1465_v13 }
 0x190   :  { %1244 = vmatpush3.bf16.msra.mxu0 %v1362_v42  ;;  %1264 = vmatpush3.bf16.msra.mxu1 %v1363_v43 }
 0x191   :  { %1245 = vmatprep.subr.bf16.mxu0 %v1465_v13  ;;  %1265 = vmatprep.subr.bf16.mxu1 %v1465_v13 }
 0x194   :  { %1246 = vmatpush3.bf16.msra.mxu0 %v1364_v44  ;;  %1266 = vmatpush3.bf16.msra.mxu1 %v1365_v45 }
 0x195   :  { %1247 = vmatprep.subr.bf16.mxu0 %v1465_v13  ;;  %1267 = vmatprep.subr.bf16.mxu1 %v1465_v13 }
 0x198   :  { %1248 = vmatpush3.bf16.msra.mxu0 %v1366_v46  ;;  %1268 = vmatpush3.bf16.msra.mxu1 %v1367_v47 }
 0x199   :  { %1249 = vmatprep.subr.bf16.mxu0 %v1465_v13  ;;  %1269 = vmatprep.subr.bf16.mxu1 %v1465_v13 }
 0x19c   :  { %1250 = vmatpush3.bf16.msra.mxu0 %v1368_v52  ;;  %1270 = vmatpush3.bf16.msra.mxu1 %v1369_v53 }
 0x19d   :  { %1251 = vmatprep.subr.bf16.mxu0 %v1465_v13  ;;  %1271 = vmatprep.subr.bf16.mxu1 %v1465_v13 }
 0x19f   :  { %v460_v61 = vpop.f32.mrb[4].mxu1 }
 0x1a0   :  { %1252 = vmatpush3.bf16.msra.mxu0 %v1370_v57  ;;  %1272 = vmatpush3.bf16.msra.mxu1 %v1371_v58  ;;  %v1237_v0 = vpop.f32.mrb[5].mxu1 }
 0x1a1   :  { %1253 = vmatprep.subr.bf16.mxu0 %v1465_v13  ;;  %1273 = vmatprep.subr.bf16.mxu1 %v1465_v13  ;;  %v463_v2 = vpop.f32.mrb[6].mxu1 }
 0x1a2   :  { %v1238_v3 = vpop.f32.mrb[7].mxu1 }
 0x1a4   :  { %1254 = vmatpush3.bf16.msra.mxu0 %v1372_v62  ;;  %1274 = vmatpush3.bf16.msra.mxu1 %v1373_v63 }
 0x1a5   :  { %1279 = vmatprep.subr.bf16.mxu0 %v1465_v13 }
 0x1a7   :  { %1256 = vmatmul.mubr.bf16.vlgmr.msra.gmra.mrb[12].mxu0 %v280_v5  ;;  %1276 = vmatmul.mubr.bf16.vlgmr.msra.gmra.mrb[12].mxu1 %v826_v4 }
 0x1a8   :  { %1295 = vmatprep.mubr.msk.bf16.mxu0 %vm1466_vm2, %v1465_v13  ;;  %1280 = vmatpush3.bf16.msra.mxu0 %v1374_v6 }
 0x1a9   :  { %1281 = vmatprep.subr.bf16.mxu0 %v1465_v13 }
 0x1ac   :  { %1282 = vmatpush3.bf16.msra.mxu0 %v1375_v7 }
 0x1ad   :  { %1283 = vmatprep.subr.bf16.mxu0 %v1465_v13 }
 0x1b0   :  { %1284 = vmatpush3.bf16.msra.mxu0 %v1376_v8 }
 0x1b1   :  { %1285 = vmatprep.subr.bf16.mxu0 %v1465_v13 }
 0x1b4   :  { %1286 = vmatpush3.bf16.msra.mxu0 %v1377_v9 }
 0x1b5   :  { %1287 = vmatprep.subr.bf16.mxu0 %v1465_v13 }
 0x1b8   :  { %1288 = vmatpush3.bf16.msra.mxu0 %v1378_v10 }
 0x1b9   :  { %1289 = vmatprep.subr.bf16.mxu0 %v1465_v13 }
 0x1bc   :  { %1290 = vmatpush3.bf16.msra.mxu0 %v1379_v11 }
 0x1bd   :  { %1291 = vmatprep.subr.bf16.mxu0 %v1465_v13 }
 0x1c0   :  { %1292 = vmatpush3.bf16.msra.mxu0 %v1380_v12 }
 0x1c1   :  { %1293 = vmatprep.subr.bf16.mxu0 %v1465_v13  ;;  %v932_v13 = vld [vmem:[#allocation6 + $0x5] ss:$0 sm:$0xff] }
 0x1c4   :  { %1294 = vmatpush3.bf16.msra.mxu0 %v1381_v14 }
 0x25a   :  { %v1158_v15 = vpop.f32.mrb[8].mxu0  ;;  %v1180_v16 = vpop.f32.mrb[8].mxu1 }
 0x25b   :  { %v1159_v17 = vpop.f32.mrb[9].mxu0  ;;  %v1181_v18 = vpop.f32.mrb[9].mxu1 }
 0x25c   :  { %v1160_v19 = vadd.f32 %v1159_v17, %v1158_v15  ;;  %v1182_v20 = vadd.f32 %v1181_v18, %v1180_v16  ;;  %v1161_v21 = vpop.f32.mrb[10].mxu0  ;;  %v1183_v22 = vpop.f32.mrb[10].mxu1 }
 0x25d   :  { %v1162_v23 = vpop.f32.mrb[11].mxu0  ;;  %v1184_v24 = vpop.f32.mrb[11].mxu1 }
 0x25e   :  { %v741_v25 = vadd.f32 %v1160_v19, %v460_v61 }
 0x260   :  { %v781_v26 = vadd.f32 %v1182_v20, %v741_v25 }
 0x27a   :  { %v820_v27 = vpop.f32.mrb[12].mxu0  ;;  %v925_v28 = vpop.f32.mrb[12].mxu1 }
 0x27b   :  { %v821_v29 = vadd.f32 %v820_v27, %v781_v26  ;;  %v1257_v30 = vpop.f32.mrb[13].mxu0  ;;  %v1277_v31 = vpop.f32.mrb[13].mxu1 }
 0x27c   :  { %v823_v32 = vpop.f32.mrb[14].mxu0  ;;  %v928_v33 = vpop.f32.mrb[14].mxu1 }
 0x27d   :  { %v931_v34 = vadd.f32 %v925_v28, %v821_v29  ;;  %v1258_v35 = vpop.f32.mrb[15].mxu0  ;;  %v1278_v36 = vpop.f32.mrb[15].mxu1 }
 0x27f   :  { %v933_v37 = vadd.f32 %v932_v13, %v931_v34 }
 0x281   :  { %v934_v38 = vmax.f32 %v933_v37, 0.0 }
 0x283   :  { %v935_v39 = vpack.c.bf16 %v934_v38, %v934_v38 }
 0x285   :  { %1296 = vmatmul.mubr.bf16.vlgmr.msra.gmra.mrb[16].mxu0 %v935_v39 }
 0x358   :  { %v1035_v41 = vpop.f32.mrb[16].mxu0 }
 0x359   :  { %v1036_v42 = vadd.f32 %v1035_v41, %v952_v40  ;;  %v1297_v43 = vpop.f32.mrb[17].mxu0 }
 0x35a   :  { %v1038_v44 = vpop.f32.mrb[18].mxu0 }
 0x35b   :  { %1041 = vmax.xlane.f32.xlu1 %v1036_v42  ;;  %v1298_v45 = vpop.f32.mrb[19].mxu0 }
 0x3e8   :  { %v1042_v46 = vpop.xlane.xlu1 %1041 }
 0x3e9   :  { %v1043_v47 = vsub.f32 %v1036_v42, %v1042_v46 }
 0x3eb   :  { %v1044_v48 = vmul.f32 1.442695, %v1043_v47 }
 0x3ed   :  { %1382 = vpow2.f32 %v1044_v48 }
 0x3f7   :  { %v1383_v49 = vpop.eup %1382 }
 0x3f8   :  { %1046 = vadd.xlane.f32.xlu0 %v1383_v49 }
 0x485   :  { %v1047_v50 = vpop.xlane.xlu0 %1046 }
 0x486   :  { %1384 = vrcp.f32 %v1047_v50 }
 0x490   :  { %v1385_v51 = vpop.eup %1384 }
 0x491   :  { %v1049_v52 = vmul.f32 %v1385_v51, %v1383_v49 }
 0x493   :  { %1050 = vst [vmem:[%s1625_s5] sm:$0xff] %v1049_v52 }
 0x494   :  { %1055 = vsyncpa [#allocation3], 1 }
 0x495   :  { %1056 = vsyncpa [#allocation5], 1 }

</bundles_post_ra>
